<compile_context>
chip_gen: v7x
topology: tpu7x:2x2x1
jax: 0.10.0
libtpu: 0.0.40
codegen_flags: <defaults>
</compile_context>

<pallas_src>
import jax
import jax.numpy as jnp
from jax.experimental import pallas as pl
from jax.experimental.pallas import tpu as pltpu


def _probe_kernel(q_ref, p_ref, wqt_ref, wpt_ref, b_ref, o_ref):
    # q_ref:   (TB, H)    query tile                (pipelined)
    # p_ref:   (TB, N*H)  flattened passage tile    (pipelined)
    # wqt_ref: (H, N)     query slice of weight^T   (VMEM-resident)
    # wpt_ref: (N*H, N)   passage slice of weight^T (VMEM-resident)
    # b_ref:   (1, N)     bias row                  (VMEM-resident)
    # o_ref:   (TB, N)    logits tile
    acc = jnp.dot(q_ref[...], wqt_ref[...], preferred_element_type=jnp.float32)
    acc = acc + jnp.dot(p_ref[...], wpt_ref[...],
                        preferred_element_type=jnp.float32)
    o_ref[...] = (acc + b_ref[...]).astype(o_ref.dtype)


def _vmem_limit_bytes():
    """Explicit scoped-VMEM limit, sized per generation.

    ~72% of physical VMEM: ~46 MiB on v7x (64 MiB/TC), ~92 MiB on v5e/v6e
    (128 MiB), capped at 100 MiB.  Passing this explicitly means we never
    design the tile around v5e's 16 MiB *default* scoped limit."""
    try:
        physical = int(pltpu.get_tpu_info().vmem_capacity_bytes)
    except Exception:
        physical = 64 * 1024 * 1024          # conservative (v7x per-TC)
    return min(int(0.72 * physical), 100 * 1024 * 1024)


def _choose_batch_tile(B, bytes_per_row, resident_bytes, vmem_limit):
    """Largest batch tile TB (multiple of 8, capped at 512 — diminishing
    returns beyond that) whose double-buffered activation DMAs fit in the VMEM
    budget.  Uses the corrected cost model: 2 pipeline buffers x TB x
    bytes_per_row (q + p rows together), not 4x.  For B > 256 the batch is
    split into at least 2 tiles so megacore sharding has work for both TCs."""
    budget = max(0, int(0.8 * vmem_limit) - resident_bytes)
    max_tb = max(8, budget // (2 * bytes_per_row))
    tb = min(B, 512, max_tb)
    if B > 256:
        half = -(-B // 2)            # ceil(B / 2)
        half = -(-half // 8) * 8     # round up to a multiple of 8
        tb = min(tb, half)
    if tb < B:
        tb = max(8, (tb // 8) * 8)   # sublane-aligned tile; cdiv grid pads the tail
    else:
        tb = B                       # single block == full dim (always legal)
    return tb


def multi_concat_probe_forward(query_emb, passage_embs, weight, bias):
    """Equivalent of MultiConcatProbe.forward.

    query_emb:    (B, H)           float32 or bfloat16
    passage_embs: (B, N, H)        same dtype as query_emb
    weight:       (N, (N+1)*H)     PyTorch nn.Linear weight layout
    bias:         (N,)
    returns:      (B, N) float32 logits
    """
    B, N, H = passage_embs.shape
    NH = N * H
    D = H + NH
    act_dtype = query_emb.dtype
    itemsize = jnp.dtype(act_dtype).itemsize

    # Layout plumbing only (one-time, tiny): flatten passages, split + transpose
    # the weight so the kernel contracts activation-minor against weight-major
    # (no per-step activation transpose), bias as a broadcastable row.
    passage_flat = passage_embs.reshape(B, NH)                # (B, N*H)
    w_qt = weight[:, :H].T.astype(act_dtype)                  # (H, N)
    w_pt = weight[:, H:].T.astype(act_dtype)                  # (N*H, N)
    b_row = bias.reshape(1, N).astype(jnp.float32)            # (1, N)

    vmem_limit = _vmem_limit_bytes()
    resident_bytes = (D * N * itemsize            # WqT + WpT
                      + N * 4                     # bias
                      + 2 * 1024 * N * 4)         # output double-buffer (overestimate)
    tb = _choose_batch_tile(B, D * itemsize, resident_bytes, vmem_limit)
    grid = (pl.cdiv(B, tb),)

    cost = pl.CostEstimate(
        flops=2 * B * D * N + B * N,
        transcendentals=0,
        bytes_accessed=B * D * itemsize + D * N * itemsize + N * 4 + B * N * 4,
    )

    logits = pl.pallas_call(
        _probe_kernel,
        out_shape=jax.ShapeDtypeStruct((B, N), jnp.float32),
        grid=grid,
        in_specs=[
            pl.BlockSpec((tb, H), lambda i: (i, 0)),    # query tile   (pipelined)
            pl.BlockSpec((tb, NH), lambda i: (i, 0)),   # passage tile (pipelined)
            pl.BlockSpec((H, N), lambda i: (0, 0)),     # WqT, VMEM-resident
            pl.BlockSpec((NH, N), lambda i: (0, 0)),    # WpT, VMEM-resident
            pl.BlockSpec((1, N), lambda i: (0, 0)),     # bias, VMEM-resident
        ],
        out_specs=pl.BlockSpec((tb, N), lambda i: (i, 0)),
        compiler_params=pltpu.CompilerParams(
            dimension_semantics=("parallel",),          # shard batch tiles over v7x's 2 TCs
            vmem_limit_bytes=vmem_limit,
        ),
        cost_estimate=cost,
    )(query_emb, passage_flat, w_qt, w_pt, b_row)

    return logits                                       # (B, N)


if __name__ == "__main__":
    # Small shapes consistent with the module's forward.
    B = 2          # batch
    H = 32         # hidden_dim
    N = 4          # num_passages
    D = (N + 1) * H

    key = jax.random.PRNGKey(0)
    k_q, k_p, k_w, k_b = jax.random.split(key, 4)

    query_emb = jax.random.normal(k_q, (B, H), dtype=jnp.float32)
    passage_embs = jax.random.normal(k_p, (B, N, H), dtype=jnp.float32)

    # Deterministic params mimicking nn.Linear's uniform(-1/sqrt(D), 1/sqrt(D)).
    bound = 1.0 / jnp.sqrt(jnp.float32(D))
    weight = jax.random.uniform(k_w, (N, D), minval=-bound, maxval=bound,
                                dtype=jnp.float32)
    bias = jax.random.uniform(k_b, (N,), minval=-bound, maxval=bound,
                              dtype=jnp.float32)

    logits = multi_concat_probe_forward(query_emb, passage_embs, weight, bias)
    logits = jax.block_until_ready(logits)

    # Reference check in plain JAX (same math as the PyTorch module).
    passage_flat = passage_embs.reshape(B, N * H)
    concat_vec = jnp.concatenate([query_emb, passage_flat], axis=1)
    ref = concat_vec @ weight.T + bias
    assert logits.shape == (B, N)
    assert jnp.allclose(logits, ref, atol=1e-5, rtol=1e-5)

    print("KERNEL_OK")
</pallas_src>

<mosaic_0001>
module attributes {stable_mosaic.version = 11 : i64} {
  func.func @_probe_kernel(%arg0: i32, %arg1: memref<2x32xf32, #tpu.memory_space<vmem>>, %arg2: memref<2x128xf32, #tpu.memory_space<vmem>>, %arg3: memref<32x4xf32, #tpu.memory_space<vmem>>, %arg4: memref<128x4xf32, #tpu.memory_space<vmem>>, %arg5: memref<1x4xf32, #tpu.memory_space<vmem>>, %arg6: memref<2x4xf32, #tpu.memory_space<vmem>>) attributes {dimension_semantics = [#tpu.dimension_semantics<parallel>], iteration_bounds = array<i64: 1>, scalar_prefetch = 0 : i64, scratch_operands = 0 : i64, tpu.core_type = #tpu.core_type<tc>, window_params = [{transform_indices = @transform_0, window_bounds = array<i64: 2, 32>}, {transform_indices = @transform_1, window_bounds = array<i64: 2, 128>}, {pipeline_mode = #tpu.pipeline_mode<synchronous>, transform_indices = @transform_2, window_bounds = array<i64: 32, 4>}, {pipeline_mode = #tpu.pipeline_mode<synchronous>, transform_indices = @transform_3, window_bounds = array<i64: 128, 4>}, {pipeline_mode = #tpu.pipeline_mode<synchronous>, transform_indices = @transform_4, window_bounds = array<i64: 1, 4>}, {transform_indices = @transform_5, window_bounds = array<i64: 2, 4>}]} {
    %c0 = arith.constant 0 : index
    %c0_0 = arith.constant 0 : index
    %0 = vector.load %arg1[%c0, %c0_0] : memref<2x32xf32, #tpu.memory_space<vmem>>, vector<2x32xf32>
    %c0_1 = arith.constant 0 : index
    %c0_2 = arith.constant 0 : index
    %1 = vector.load %arg3[%c0_1, %c0_2] : memref<32x4xf32, #tpu.memory_space<vmem>>, vector<32x4xf32>
    %cst = arith.constant dense<0.000000e+00> : vector<2x4xf32>
    %2 = tpu.matmul %0, %1, %cst {dimension_numbers = #tpu.dot_dimension_numbers<[1], [0], [0], [1], [0, 0, 1, 1], [], []>} : vector<2x32xf32>, vector<32x4xf32>, vector<2x4xf32> -> vector<2x4xf32>
    %c0_3 = arith.constant 0 : index
    %c0_4 = arith.constant 0 : index
    %3 = vector.load %arg2[%c0_3, %c0_4] : memref<2x128xf32, #tpu.memory_space<vmem>>, vector<2x128xf32>
    %c0_5 = arith.constant 0 : index
    %c0_6 = arith.constant 0 : index
    %4 = vector.load %arg4[%c0_5, %c0_6] : memref<128x4xf32, #tpu.memory_space<vmem>>, vector<128x4xf32>
    %cst_7 = arith.constant dense<0.000000e+00> : vector<2x4xf32>
    %5 = tpu.matmul %3, %4, %cst_7 {dimension_numbers = #tpu.dot_dimension_numbers<[1], [0], [0], [1], [0, 0, 1, 1], [], []>} : vector<2x128xf32>, vector<128x4xf32>, vector<2x4xf32> -> vector<2x4xf32>
    %6 = arith.addf %2, %5 : vector<2x4xf32>
    %c0_8 = arith.constant 0 : index
    %c0_9 = arith.constant 0 : index
    %7 = vector.load %arg5[%c0_8, %c0_9] : memref<1x4xf32, #tpu.memory_space<vmem>>, vector<1x4xf32>
    %8 = vector.broadcast %7 : vector<1x4xf32> to vector<2x4xf32>
    %9 = arith.addf %6, %8 : vector<2x4xf32>
    %c0_10 = arith.constant 0 : index
    %c0_11 = arith.constant 0 : index
    %10 = vector.load %arg6[%c0_10, %c0_11] : memref<2x4xf32, #tpu.memory_space<vmem>>, vector<2x4xf32>
    tpu.vector_store %arg6[%c0_10, %c0_11], %9 {strides = array<i32>} : memref<2x4xf32, #tpu.memory_space<vmem>>, vector<2x4xf32>,
    return
  }
  func.func @transform_0(%arg0: i32) -> (i32, i32) {
    %c0_i32 = arith.constant 0 : i32
    %c0_i32_0 = arith.constant 0 : i32
    return %arg0, %c0_i32 : i32, i32
  }
  func.func @transform_1(%arg0: i32) -> (i32, i32) {
    %c0_i32 = arith.constant 0 : i32
    %c0_i32_0 = arith.constant 0 : i32
    return %arg0, %c0_i32 : i32, i32
  }
  func.func @transform_2(%arg0: i32) -> (i32, i32) {
    %c0_i32 = arith.constant 0 : i32
    %c0_i32_0 = arith.constant 0 : i32
    %c0_i32_1 = arith.constant 0 : i32
    return %c0_i32, %c0_i32_0 : i32, i32
  }
  func.func @transform_3(%arg0: i32) -> (i32, i32) {
    %c0_i32 = arith.constant 0 : i32
    %c0_i32_0 = arith.constant 0 : i32
    %c0_i32_1 = arith.constant 0 : i32
    return %c0_i32, %c0_i32_0 : i32, i32
  }
  func.func @transform_4(%arg0: i32) -> (i32, i32) {
    %c0_i32 = arith.constant 0 : i32
    %c0_i32_0 = arith.constant 0 : i32
    %c0_i32_1 = arith.constant 0 : i32
    return %c0_i32, %c0_i32_0 : i32, i32
  }
  func.func @transform_5(%arg0: i32) -> (i32, i32) {
    %c0_i32 = arith.constant 0 : i32
    %c0_i32_0 = arith.constant 0 : i32
    return %arg0, %c0_i32 : i32, i32
  }
}

</mosaic_0001>

<bundles_post_ra>
// kernel: tpu_custom_call.1
= control target key start
LH: loop header
LB: loop body
LE: loop exit
PB: predicated region body
PF: predicated region fallthrough
CT: control target
= control target key end

     0   :  { %v339_v3 = vmov 0.0|0.0   ;;  %vm340_vm0 = vmmov 0   ;;  %v341_v6 = vmov 0.0   ;;  %s454_s0 = inlined_call_operand.vmem [shape: f32[2,32], index: 0, kind: input, shape index: {}]   ;;  %s455_s1 = inlined_call_operand.vmem [shape: f32[2,128], index: 1, kind: input, shape index: {}]   ;;  %s456_s2 = inlined_call_operand.vmem [shape: f32[32,4], index: 2, kind: input, shape index: {}]   ;;  %s457_s3 = inlined_call_operand.vmem [shape: f32[128,4], index: 3, kind: input, shape index: {}]   ;;  %s458_s4 = inlined_call_operand.vmem [shape: f32[1,4], index: 4, kind: input, shape index: {}]   ;;  %s459_s5 = inlined_call_operand.hbm [shape: f32[2,4], index: 5, kind: output, shape index: {}]  }
   0x1   :  { %v27_v0 = vld [vmem:[%s457_s3] sm:$0xff]  ;;  %v28_v1 = vld [vmem:[%s457_s3 + $0x8] sm:$0xff]  ;;  %v29_v2 = vld [vmem:[%s457_s3 + $0x10] sm:$0xff]  ;;  %281 = vmatprep.subr.bf16.mxu0 %v339_v3  ;;  %305 = vmatprep.subr.bf16.mxu1 %v339_v3 }
   0x2   :  { %v282_v4 = vpack.c.bf16 %v28_v1, %v27_v0  ;;  %v30_v5 = vld [vmem:[%s457_s3 + $0x18] sm:$0xff]  ;;  %278 = vmatprep.mubr.msk.f32.mxu1 %vm340_vm0, %v341_v6  ;;  %267 = vmatprep.mubr.msk.f32.mxu0 %vm340_vm0, %v341_v6  ;;  %v31_v8 = vld [vmem:[%s457_s3 + $0x20] sm:$0xff]  ;;  %v32_v9 = vld [vmem:[%s457_s3 + $0x28] sm:$0xff] }
   0x3   :  { %v285_v7 = vpack.c.bf16 %v30_v5, %v29_v2  ;;  %v22_v10 = vld [vmem:[%s456_s2] sm:$0xff]  ;;  %v23_v11 = vld [vmem:[%s456_s2 + $0x8] sm:$0xff]  ;;  %v24_v13 = vld [vmem:[%s456_s2 + $0x10] sm:$0xff]  ;;  %v288_v15 = vpack.c.bf16 %v32_v9, %v31_v8 }
   0x4   :  { %283 = vmatpush3.bf16.msra.mxu0 %v282_v4  ;;  %v306_v12 = vpack.c.bf16 %v23_v11, %v22_v10  ;;  %v25_v14 = vld [vmem:[%s456_s2 + $0x18] sm:$0xff] }
   0x5   :  { %284 = vmatprep.subr.bf16.mxu0 %v339_v3  ;;  %v309_v16 = vpack.c.bf16 %v25_v14, %v24_v13 }
   0x6   :  { %307 = vmatpush3.bf16.msra.mxu1 %v306_v12 }
   0x8   :  { %286 = vmatpush3.bf16.msra.mxu0 %v285_v7 }
   0x9   :  { %10 = vsyncpa [#allocation3], 0  ;;  %287 = vmatprep.subr.bf16.mxu0 %v339_v3  ;;  %v33_v17 = vld [vmem:[%s457_s3 + $0x30] sm:$0xff]  ;;  %v34_v18 = vld [vmem:[%s457_s3 + $0x38] sm:$0xff]  ;;  %308 = vmatprep.subr.bf16.mxu1 %v339_v3  ;;  %vm113_vm1 = vcmask 261120   ;;  %s342_s12 = smov [#allocation2]  }
   0xa   :  { %v291_v19 = vpack.c.bf16 %v34_v18, %v33_v17  ;;  %310 = vmatpush3.bf16.msra.mxu1 %v309_v16  ;;  %v21_v20 = vld [vmem:[%s454_s0] sm:$0x3]  ;;  %v36_v22 = vld [vmem:[%s457_s3 + $0x48] sm:$0xff]  ;;  %v37_v24 = vld [vmem:[%s457_s3 + $0x50] sm:$0xff]  ;;  %s203_s13 = sshll.u32 %s342_s12, 4  ;;  %vm195_vm2 = vcmask 25600   ;;  %s204_s13 = int_to_ptr.vmem [resolvable:$true] %s203_s13 }
   0xb   :  { %v35_v21 = vld [vmem:[%s457_s3 + $0x40] sm:$0xff]  ;;  %v38_v25 = vld [vmem:[%s457_s3 + $0x58] sm:$0xff]  ;;  %v40_v28 = vld [vmem:[%s457_s3 + $0x68] sm:$0xff]  ;;  %p320_p1 = scmp.lt.s32.totalorder %s204_s13, %s204_s13 }
   0xc   :  { %289 = vmatpush3.bf16.msra.mxu0 %v288_v15  ;;  %v294_v23 = vpack.c.bf16 %v36_v22, %v35_v21  ;;  %v297_v26 = vpack.c.bf16 %v38_v25, %v37_v24  ;;  %v39_v27 = vld [vmem:[%s457_s3 + $0x60] sm:$0xff]  ;;  %v41_v30 = vld [vmem:[%s457_s3 + $0x70] sm:$0xff]  ;;  %v42_v31 = vld [vmem:[%s457_s3 + $0x78] sm:$0xff]  ;;  %s315_s3 = scalar_lea.vmem %s204_s13, 32 }
   0xd   :  { %290 = vmatprep.subr.bf16.mxu0 %v339_v3  ;;  %279 = vmatmul.mubr.msk.f32.vlgmr.msra.gmra.mrb[0].mxu1 %vm113_vm1, %v21_v20  ;;  %v300_v29 = vpack.c.bf16 %v40_v28, %v39_v27  ;;  %v303_v32 = vpack.c.bf16 %v42_v31, %v41_v30  ;;  %v26_v33 = vld [vmem:[%s455_s1] sm:$0x3]  ;;  %p316_p0 = scmp.ne.s32.totalorder %s204_s13, %s315_s3  ;;  %p321_p2 = scmp.lt.s32.totalorder %s315_s3, %s315_s3 }
   0xe   :  { %v212_v37 = vld [vmem:[%s458_s4] ss:$0 sm:$0xff] }
   0xf   :  { %p322_p3 = por %p321_p2, %p320_p1 }
  0x10   :  { %292 = vmatpush3.bf16.msra.mxu0 %v291_v19 }
  0x11   :  { %293 = vmatprep.subr.bf16.mxu0 %v339_v3  ;;  %p323_p4 = pnand %p322_p3, %p316_p0 }
  0x14   :  { %295 = vmatpush3.bf16.msra.mxu0 %v294_v23 }
  0x15   :  { %296 = vmatprep.subr.bf16.mxu0 %v339_v3 }
  0x18   :  { %298 = vmatpush3.bf16.msra.mxu0 %v297_v26 }
  0x19   :  { %299 = vmatprep.subr.bf16.mxu0 %v339_v3 }
  0x1c   :  { %301 = vmatpush3.bf16.msra.mxu0 %v300_v29 }
  0x1d   :  { %302 = vmatprep.subr.bf16.mxu0 %v339_v3 }
  0x20   :  { %304 = vmatpush3.bf16.msra.mxu0 %v303_v32 }
  0x23   :  { %268 = vmatmul.mubr.f32.vlgmr.msra.gmra.mrb[0].mxu0 %v26_v33 }
  0xe0   :  { %v183_v34 = vpop.f32.mrb[0].mxu1 }
  0xe1   :  { %v280_v35 = vpop.f32.mrb[1].mxu1 }
  0xf6   :  { %v109_v36 = vpop.f32.mrb[0].mxu0 }
  0xf7   :  { %v184_v38 = vadd.f32 %v183_v34, %v109_v36  ;;  %v269_v39 = vpop.f32.mrb[1].mxu0 }
  0xf9   :  { %v194_v40 = vadd.f32 %v212_v37, %v184_v38 }
  0xfb   :  { %196 = vst.msk [vmem:[#allocation2] sm:$0x3] %vm195_vm2, %v194_v40 }
  0xfc   :  { %326 = shalt.err (!%p323_p4)
}
  0xfd   :  { %s327_s15 = scalar_lea.hbm %s459_s5, 32 }
  0xfe   :  { %p328_p5 = scmp.ne.s32.totalorder %s459_s5, %s327_s15  ;;  %p331_p6 = scmp.lt.u32.totalorder %s327_s15, %s459_s5 }
 0x100   :  { %p333_p7 = pnand %p331_p6, %p328_p5 }
 0x102   :  { %336 = shalt.err (!%p333_p7)
}
 0x103   :  { %206 = dma.vmem_to_hbm [thread:$0]  %s204_s13, 32, %s459_s5, [#allocation3]  }
 0x104   :  { %337 = dma.done.wait [#allocation3], 32  }
 0x105   :  { %338 = vsyncadd [#allocation3], 4294967264 }
 0x106   :  { %210 = vsyncpa [#allocation3], 1 }

</bundles_post_ra>
